<compile_context>
chip_gen: v5e
topology: v5e:2x2
jax: 0.10.0
libtpu: 0.0.40
codegen_flags: <defaults>
</compile_context>

<pallas_src>
import jax
import jax.numpy as jnp
from jax.experimental import pallas as pl
from jax.experimental.pallas import tpu as pltpu

EPS = 1e-6          # F.pairwise_distance default eps
MARGIN = 5.0        # TripletLossC default triplet_margin


def _cdiv(a, b):
    return (a + b - 1) // b


def _round_up(x, m):
    return ((x + m - 1) // m) * m


def _make_kernel(d_true, tb, td, n_kd):
    """Build the kernel with static tiling constants closed over."""
    last_k = n_kd - 1
    # Only the final D block can contain out-of-bounds lanes (the inputs are
    # NOT padded host-side, so those lanes are undefined) -> mask only there.
    needs_mask = (n_kd * td != d_true)
    last_valid = d_true - last_k * td          # valid lanes inside last block

    def kernel(a_ref, p_ref, n_ref, loss_ref, sqp_acc, sqn_acc):
        k = pl.program_id(1)

        @pl.when(k == 0)
        def _init():
            sqp_acc[...] = jnp.zeros_like(sqp_acc)
            sqn_acc[...] = jnp.zeros_like(sqn_acc)

        a = a_ref[...].astype(jnp.float32)
        p = p_ref[...].astype(jnp.float32)
        n = n_ref[...].astype(jnp.float32)

        def _accumulate(mask_oob_lanes):
            # F.pairwise_distance: norm of (x1 - x2 + eps) along feature dim.
            dp = a - p + EPS
            dn = a - n + EPS
            if mask_oob_lanes:
                lane = jax.lax.broadcasted_iota(jnp.int32, (tb, td), 1)
                valid = lane < last_valid
                dp = jnp.where(valid, dp, 0.0)
                dn = jnp.where(valid, dn, 0.0)
            # keepdims=True keeps the natural (sublane, lane) layout.
            sqp_acc[...] += jnp.sum(dp * dp, axis=-1, keepdims=True)
            sqn_acc[...] += jnp.sum(dn * dn, axis=-1, keepdims=True)

        if needs_mask:
            @pl.when(k != last_k)
            def _bulk():
                _accumulate(False)

            @pl.when(k == last_k)
            def _tail():
                _accumulate(True)
        else:
            _accumulate(False)

        # sqrt / relu only after the full-D accumulation.
        @pl.when(k == last_k)
        def _finalize():
            d_pos = jnp.sqrt(sqp_acc[...])
            d_neg = jnp.sqrt(sqn_acc[...])
            loss_ref[...] = jnp.maximum(d_pos - d_neg + MARGIN, 0.0)

    return kernel


def triplet_loss_c(rep_anchor, rep_pos, rep_neg, *, max_block_b=1024, max_block_d=2048):
    """Pallas TPU implementation of TripletLossC.forward (EUCLIDEAN, margin=5)."""
    # TODO(synk): only the default EUCLIDEAN metric is implemented; the COSINE /
    # MANHATTAN TripletDistanceMetric variants are not.
    assert rep_anchor.shape == rep_pos.shape == rep_neg.shape
    assert rep_anchor.ndim == 2, "expected (batch, hidden) representations"
    assert max_block_b % 8 == 0 and max_block_b >= 8
    assert max_block_d % 128 == 0 and max_block_d >= 128

    B, D = rep_anchor.shape
    itemsize = jnp.dtype(rep_anchor.dtype).itemsize

    # Generation-aware VMEM capacity (v5e/v6e: 128 MiB; v7x: 64 MiB per TC).
    try:
        vmem_cap = int(pltpu.get_tpu_info().vmem_capacity_bytes)
    except Exception:
        vmem_cap = 64 * 2**20          # conservative fallback works everywhere

    # ---- D (reduction) tiling: one block if it fits, else balanced blocks ---
    if D <= max_block_d:
        td = D                                     # block == full dim, no mask
    else:
        td = _round_up(_cdiv(D, _cdiv(D, max_block_d)), 128)
    n_kd = _cdiv(D, td)

    # ---- B (parallel) tiling -------------------------------------------------
    # Target ~1M (64 MiB parts) / ~2M (128 MiB parts) elements per input block
    # so per-grid-step overhead is amortized, balance the blocks, and force at
    # least 2 blocks on the parallel axis so v7x's two TensorCores both work.
    target_elems = (1 if vmem_cap <= 96 * 2**20 else 2) * 2**20
    tb_target = max(8, min(max_block_b, (target_elems // max(1, td)) // 8 * 8))
    n_b = _cdiv(B, tb_target)
    if n_b == 1 and B >= 16:
        n_b = 2
    tb = _round_up(_cdiv(B, n_b), 8)
    grid = (_cdiv(B, tb), n_kd)                    # reduction (D) axis last

    # ---- explicit VMEM budget (so v7x's 64 MiB is never exceeded) -----------
    in_bytes = 3 * 2 * tb * td * itemsize          # 3 inputs, double-buffered
    compute_bytes = 4 * tb * td * 4                # f32 upcasts / dp / dn temps
    small_bytes = 4 * tb * 128 * 4                 # out block + accumulators
    needed = in_bytes + compute_bytes + small_bytes
    vmem_limit = int(max(32 * 2**20,
                         min(vmem_cap - 8 * 2**20, needed + 8 * 2**20)))

    in_spec = pl.BlockSpec((tb, td), lambda i, k: (i, k))

    losses = pl.pallas_call(
        _make_kernel(D, tb, td, n_kd),
        out_shape=jax.ShapeDtypeStruct((B, 1), jnp.float32),
        grid_spec=pltpu.PrefetchScalarGridSpec(
            num_scalar_prefetch=0,
            grid=grid,
            in_specs=[in_spec, in_spec, in_spec],
            out_specs=pl.BlockSpec((tb, 1), lambda i, k: (i, 0)),
            scratch_shapes=[pltpu.VMEM((tb, 1), jnp.float32),
                            pltpu.VMEM((tb, 1), jnp.float32)],
        ),
        compiler_params=pltpu.CompilerParams(
            dimension_semantics=("parallel", "arbitrary"),
            vmem_limit_bytes=vmem_limit,
        ),
    )(rep_anchor, rep_pos, rep_neg)

    # Tiny final reduction in XLA; the output has exactly B rows (no padding).
    return jnp.mean(losses)


if __name__ == "__main__":
    def _ref(a, p, n):
        d_pos = jnp.sqrt(jnp.sum((a - p + EPS) ** 2, axis=-1))
        d_neg = jnp.sqrt(jnp.sum((a - n + EPS) ** 2, axis=-1))
        return jnp.mean(jnp.maximum(d_pos - d_neg + MARGIN, 0.0))

    key = jax.random.PRNGKey(0)

    cases = [
        # (B, D, kwargs) — small sentence-embedding-triplet shapes
        (8, 32, {}),                        # single block, D == full dim
        (5, 32, {}),                        # ragged batch (< 8 rows)
        (8, 200, dict(max_block_d=128)),    # D tiled: accumulator + tail lane mask
        (21, 200, {}),                      # >=2 parallel B blocks + ragged last B block
        (40, 384, dict(max_block_d=256)),   # 2 B blocks x 2 D blocks, D % TD != 0
    ]
    for idx, (B, D, kw) in enumerate(cases):
        key, k0, k1, k2 = jax.random.split(key, 4)
        a = jax.random.normal(k0, (B, D), dtype=jnp.float32)
        p = jax.random.normal(k1, (B, D), dtype=jnp.float32)
        n = jax.random.normal(k2, (B, D), dtype=jnp.float32)
        out = triplet_loss_c(a, p, n, **kw)
        jax.block_until_ready(out)
        ref = _ref(a, p, n)
        assert jnp.allclose(out, ref, rtol=1e-5, atol=1e-5), (idx, out, ref)

    print("KERNEL_OK")
</pallas_src>

<mosaic_0001>
module attributes {stable_mosaic.version = 11 : i64} {
  func.func @kernel(%arg0: i32, %arg1: i32, %arg2: memref<8x32xf32, #tpu.memory_space<vmem>>, %arg3: memref<8x32xf32, #tpu.memory_space<vmem>>, %arg4: memref<8x32xf32, #tpu.memory_space<vmem>>, %arg5: memref<8x1xf32, #tpu.memory_space<vmem>>, %arg6: memref<8x1xf32, #tpu.memory_space<vmem>>, %arg7: memref<8x1xf32, #tpu.memory_space<vmem>>) attributes {dimension_semantics = [#tpu.dimension_semantics<parallel>, #tpu.dimension_semantics<arbitrary>], iteration_bounds = array<i64: 1, 1>, scalar_prefetch = 0 : i64, scratch_operands = 2 : i64, tpu.core_type = #tpu.core_type<tc>, window_params = [{transform_indices = @transform_0, window_bounds = array<i64: 8, 32>}, {transform_indices = @transform_1, window_bounds = array<i64: 8, 32>}, {transform_indices = @transform_2, window_bounds = array<i64: 8, 32>}, {transform_indices = @transform_3, window_bounds = array<i64: 8, 1>}]} {
    %c0_i32 = arith.constant 0 : i32
    %0 = arith.cmpi eq, %arg1, %c0_i32 : i32
    %1 = arith.extui %0 : i1 to i32
    %c0_i32_0 = arith.constant 0 : i32
    %2 = arith.cmpi ne, %1, %c0_i32_0 : i32
    scf.if %2 {
      %cst_19 = arith.constant 0.000000e+00 : f32
      %27 = vector.broadcast %cst_19 : f32 to vector<8x1xf32>
      %c0_20 = arith.constant 0 : index
      %c0_21 = arith.constant 0 : index
      %28 = vector.load %arg6[%c0_20, %c0_21] : memref<8x1xf32, #tpu.memory_space<vmem>>, vector<8x1xf32>
      tpu.vector_store %arg6[%c0_20, %c0_21], %27 {strides = array<i32>} : memref<8x1xf32, #tpu.memory_space<vmem>>, vector<8x1xf32>,
      %cst_22 = arith.constant 0.000000e+00 : f32
      %29 = vector.broadcast %cst_22 : f32 to vector<8x1xf32>
      %c0_23 = arith.constant 0 : index
      %c0_24 = arith.constant 0 : index
      %30 = vector.load %arg7[%c0_23, %c0_24] : memref<8x1xf32, #tpu.memory_space<vmem>>, vector<8x1xf32>
      tpu.vector_store %arg7[%c0_23, %c0_24], %29 {strides = array<i32>} : memref<8x1xf32, #tpu.memory_space<vmem>>, vector<8x1xf32>,
    } else {
    }
    %c0 = arith.constant 0 : index
    %c0_1 = arith.constant 0 : index
    %3 = vector.load %arg2[%c0, %c0_1] : memref<8x32xf32, #tpu.memory_space<vmem>>, vector<8x32xf32>
    %c0_2 = arith.constant 0 : index
    %c0_3 = arith.constant 0 : index
    %4 = vector.load %arg3[%c0_2, %c0_3] : memref<8x32xf32, #tpu.memory_space<vmem>>, vector<8x32xf32>
    %c0_4 = arith.constant 0 : index
    %c0_5 = arith.constant 0 : index
    %5 = vector.load %arg4[%c0_4, %c0_5] : memref<8x32xf32, #tpu.memory_space<vmem>>, vector<8x32xf32>
    %6 = arith.subf %3, %4 : vector<8x32xf32>
    %cst = arith.constant 9.99999997E-7 : f32
    %7 = vector.broadcast %cst : f32 to vector<8x32xf32>
    %8 = arith.addf %6, %7 : vector<8x32xf32>
    %9 = arith.subf %3, %5 : vector<8x32xf32>
    %cst_6 = arith.constant 9.99999997E-7 : f32
    %10 = vector.broadcast %cst_6 : f32 to vector<8x32xf32>
    %11 = arith.addf %9, %10 : vector<8x32xf32>
    %c0_7 = arith.constant 0 : index
    %c0_8 = arith.constant 0 : index
    %12 = vector.load %arg6[%c0_7, %c0_8] : memref<8x1xf32, #tpu.memory_space<vmem>>, vector<8x1xf32>
    %13 = arith.mulf %8, %8 : vector<8x32xf32>
    %cst_9 = arith.constant dense<0.000000e+00> : vector<8xf32>
    %14 = vector.multi_reduction <add>, %13, %cst_9 [1] : vector<8x32xf32> to vector<8xf32>
    %15 = vector.shape_cast %14 : vector<8xf32> to vector<8x1xf32>
    %16 = arith.addf %12, %15 : vector<8x1xf32>
    %c0_10 = arith.constant 0 : index
    %c0_11 = arith.constant 0 : index
    %17 = vector.load %arg6[%c0_10, %c0_11] : memref<8x1xf32, #tpu.memory_space<vmem>>, vector<8x1xf32>
    tpu.vector_store %arg6[%c0_10, %c0_11], %16 {strides = array<i32>} : memref<8x1xf32, #tpu.memory_space<vmem>>, vector<8x1xf32>,
    %c0_12 = arith.constant 0 : index
    %c0_13 = arith.constant 0 : index
    %18 = vector.load %arg7[%c0_12, %c0_13] : memref<8x1xf32, #tpu.memory_space<vmem>>, vector<8x1xf32>
    %19 = arith.mulf %11, %11 : vector<8x32xf32>
    %cst_14 = arith.constant dense<0.000000e+00> : vector<8xf32>
    %20 = vector.multi_reduction <add>, %19, %cst_14 [1] : vector<8x32xf32> to vector<8xf32>
    %21 = vector.shape_cast %20 : vector<8xf32> to vector<8x1xf32>
    %22 = arith.addf %18, %21 : vector<8x1xf32>
    %c0_15 = arith.constant 0 : index
    %c0_16 = arith.constant 0 : index
    %23 = vector.load %arg7[%c0_15, %c0_16] : memref<8x1xf32, #tpu.memory_space<vmem>>, vector<8x1xf32>
    tpu.vector_store %arg7[%c0_15, %c0_16], %22 {strides = array<i32>} : memref<8x1xf32, #tpu.memory_space<vmem>>, vector<8x1xf32>,
    %c0_i32_17 = arith.constant 0 : i32
    %24 = arith.cmpi eq, %arg1, %c0_i32_17 : i32
    %25 = arith.extui %24 : i1 to i32
    %c0_i32_18 = arith.constant 0 : i32
    %26 = arith.cmpi ne, %25, %c0_i32_18 : i32
    scf.if %26 {
      %c0_19 = arith.constant 0 : index
      %c0_20 = arith.constant 0 : index
      %27 = vector.load %arg6[%c0_19, %c0_20] : memref<8x1xf32, #tpu.memory_space<vmem>>, vector<8x1xf32>
      %28 = math.sqrt %27 : vector<8x1xf32>
      %c0_21 = arith.constant 0 : index
      %c0_22 = arith.constant 0 : index
      %29 = vector.load %arg7[%c0_21, %c0_22] : memref<8x1xf32, #tpu.memory_space<vmem>>, vector<8x1xf32>
      %30 = math.sqrt %29 : vector<8x1xf32>
      %31 = arith.subf %28, %30 : vector<8x1xf32>
      %cst_23 = arith.constant 5.000000e+00 : f32
      %32 = vector.broadcast %cst_23 : f32 to vector<8x1xf32>
      %33 = arith.addf %31, %32 : vector<8x1xf32>
      %cst_24 = arith.constant 0.000000e+00 : f32
      %34 = vector.broadcast %cst_24 : f32 to vector<8x1xf32>
      %35 = arith.maximumf %33, %34 : vector<8x1xf32>
      %c0_25 = arith.constant 0 : index
      %c0_26 = arith.constant 0 : index
      %36 = vector.load %arg5[%c0_25, %c0_26] : memref<8x1xf32, #tpu.memory_space<vmem>>, vector<8x1xf32>
      tpu.vector_store %arg5[%c0_25, %c0_26], %35 {strides = array<i32>} : memref<8x1xf32, #tpu.memory_space<vmem>>, vector<8x1xf32>,
    } else {
    }
    return
  }
  func.func @transform_0(%arg0: i32, %arg1: i32) -> (i32, i32) {
    %c0_i32 = arith.constant 0 : i32
    return %arg0, %arg1 : i32, i32
  }
  func.func @transform_1(%arg0: i32, %arg1: i32) -> (i32, i32) {
    %c0_i32 = arith.constant 0 : i32
    return %arg0, %arg1 : i32, i32
  }
  func.func @transform_2(%arg0: i32, %arg1: i32) -> (i32, i32) {
    %c0_i32 = arith.constant 0 : i32
    return %arg0, %arg1 : i32, i32
  }
  func.func @transform_3(%arg0: i32, %arg1: i32) -> (i32, i32) {
    %c0_i32 = arith.constant 0 : i32
    %c0_i32_0 = arith.constant 0 : i32
    return %arg0, %c0_i32 : i32, i32
  }
}

</mosaic_0001>

<bundles_post_ra>
// kernel: tpu_custom_call.1
= control target key start
LH: loop header
LB: loop body
LE: loop exit
PB: predicated region body
PF: predicated region fallthrough
CT: control target
= control target key end

     0   :  { %8 = vsyncpa [#allocation5], 0  ;;  %s249_s0 = inlined_call_operand.hbm [shape: f32[8,32], index: 0, kind: input, shape index: {}]   ;;  %s250_s1 = inlined_call_operand.hbm [shape: f32[8,32], index: 1, kind: input, shape index: {}]   ;;  %s251_s2 = inlined_call_operand.hbm [shape: f32[8,32], index: 2, kind: input, shape index: {}]   ;;  %s252_s3 = inlined_call_operand.vmem [shape: f32[8,1], index: 3, kind: output, shape index: {}]  }
   0x1   :  { %9 = vsyncpa [#allocation7], 0  ;;  %s26_s14 = sshll.u32 %s250_s1, 4  ;;  %s208_s15 = smov [#allocation6]   ;;  %s27_s14 = int_to_ptr.hbm [resolvable:$true] %s26_s14 }
   0x2   :  { %s28_s16 = sshll.u32 %s208_s15, 4  ;;  %s15_s19 = sshll.u32 %s249_s0, 4  ;;  %s29_s16 = int_to_ptr.vmem [resolvable:$true] %s28_s16  ;;  %s16_s19 = int_to_ptr.hbm [resolvable:$true] %s15_s19 }
   0x3   :  { %31 = dma.hbm_to_vmem [thread:$0]  %s27_s14, 128, %s29_s16, [#allocation7]  }
   0x4   :  { %s209_s20 = smov [#allocation4]   ;;  %s37_s24 = sshll.u32 %s251_s2, 4  ;;  %s38_s24 = int_to_ptr.hbm [resolvable:$true] %s37_s24 }
   0x5   :  { %s17_s21 = sshll.u32 %s209_s20, 4  ;;  %s210_s1 = smov [#allocation8]   ;;  %s18_s21 = int_to_ptr.vmem [resolvable:$true] %s17_s21 }
   0x6   :  { %20 = dma.hbm_to_vmem [thread:$0]  %s16_s19, 128, %s18_s21, [#allocation5]  }
   0x7   :  { %s39_s25 = sshll.u32 %s210_s1, 4  ;;  %s40_s25 = int_to_ptr.vmem [resolvable:$true] %s39_s25 }
   0x8   :  { %42 = dma.hbm_to_vmem [thread:$0]  %s38_s24, 128, %s40_s25, [#allocation7]  }
   0x9   :  { %204 = dma.done.wait [#allocation5], 128  }
   0xa   :  { %205 = vsyncadd [#allocation5], 4294967168 }
   0xb   :  { %206 = dma.done.wait [#allocation7], 256  }
   0xc   :  { %207 = vsyncadd [#allocation7], 4294967040  ;;  %vm59_vm0 = vcmask 7168   ;;  %v211_v0 = vmov 0.0   ;;  %v62_v1 = vld [vmem:[#allocation4] sm:$0xff]  ;;  %v63_v2 = vld [vmem:[#allocation6] sm:$0xff] }
   0xd   :  { %60 = vst.msk [vmem:[#allocation2] sm:$0xff] %vm59_vm0, %v211_v0  ;;  %v64_v3 = vld [vmem:[#allocation8] sm:$0xff]  ;;  %v65_v4 = vsub.f32 %v62_v1, %v63_v2  ;;  %vm71_vm1 = vcmask 261120  }
   0xe   :  { %61 = vst.msk [vmem:[#allocation3] sm:$0xff] %vm59_vm0, %v211_v0  ;;  %v67_v5 = vsub.f32 %v62_v1, %v64_v3 }
   0xf   :  { %v66_v6 = vadd.f32 1e-06, %v65_v4 }
  0x10   :  { %v68_v8 = vadd.f32 1e-06, %v67_v5 }
  0x11   :  { %v70_v7 = vmul.f32 %v66_v6, %v66_v6 }
  0x12   :  { %v79_v10 = vmul.f32 %v68_v8, %v68_v8 }
  0x13   :  { %v72_v9 = vsel %vm71_vm1, %v70_v7, 0.0 }
  0x14   :  { %73 = vadd.xlane.f32.xlu0 %v72_v9  ;;  %v80_v11 = vsel %vm71_vm1, %v79_v10, 0.0  ;;  %v69_v12 = vld [vmem:[#allocation2] sm:$0xff] }
  0x15   :  { %v78_v15 = vld [vmem:[#allocation3] sm:$0xff] }
  0x1c   :  { %81 = vadd.xlane.f32.xlu0 %v80_v11 }
  0x87   :  { %v74_v13 = vpop.xlane.xlu0 %73 }
  0x88   :  { %v75_v14 = vadd.f32 %v74_v13, %v69_v12 }
  0x8a   :  { %77 = vst.msk [vmem:[#allocation2] sm:$0xff] %vm59_vm0, %v75_v14 }
  0x8f   :  { %v82_v16 = vpop.xlane.xlu0 %81 }
  0x90   :  { %v83_v17 = vadd.f32 %v82_v16, %v78_v15 }
  0x91   :  { %v88_v18 = vld [vmem:[#allocation2] sm:$0xff] }
  0x92   :  { %128 = vrsqrt.f32 %v88_v18  ;;  %84 = vst.msk [vmem:[#allocation3] sm:$0xff] %vm59_vm0, %v83_v17  ;;  %vm96_vm2 = vcmp.eq.f32.partialorder %v88_v18, inf  ;;  %v99_v35 = vand.u32 2147483648, %v88_v18  ;;  %vm98_vm4 = vcmp.eq.f32.partialorder %v88_v18, 0.0 }
  0x98   :  { %v129_v19 = vpop.eup %128 }
  0x99   :  { %v90_v20 = vmul.f32 %v129_v19, %v88_v18  ;;  %v101_v21 = vld [vmem:[#allocation3] sm:$0xff] }
  0x9a   :  { %130 = vrsqrt.f32 %v101_v21  ;;  %vm109_vm3 = vcmp.eq.f32.partialorder %v101_v21, inf  ;;  %v112_v36 = vand.u32 2147483648, %v101_v21  ;;  %vm111_vm5 = vcmp.eq.f32.partialorder %v101_v21, 0.0 }
  0x9b   :  { %v91_v22 = vmul.f32 %v129_v19, %v90_v20 }
  0x9d   :  { %v92_v23 = vmul.f32 0.5, %v91_v22 }
  0x9f   :  { %v93_v24 = vsub.f32 1.5, %v92_v23 }
  0xa0   :  { %v131_v25 = vpop.eup %130 }
  0xa1   :  { %v103_v26 = vmul.f32 %v131_v25, %v101_v21  ;;  %v94_v27 = vmul.f32 %v129_v19, %v93_v24 }
  0xa3   :  { %v104_v28 = vmul.f32 %v131_v25, %v103_v26  ;;  %v95_v30 = vmul.f32 %v94_v27, %v88_v18 }
  0xa5   :  { %v105_v29 = vmul.f32 0.5, %v104_v28  ;;  %v97_v33 = vsel %vm96_vm2, %v88_v18, %v95_v30 }
  0xa6   :  { %v100_v38 = vsel %vm98_vm4, %v99_v35, %v97_v33 }
  0xa7   :  { %v106_v31 = vsub.f32 1.5, %v105_v29 }
  0xa9   :  { %v107_v32 = vmul.f32 %v131_v25, %v106_v31 }
  0xab   :  { %v108_v34 = vmul.f32 %v107_v32, %v101_v21 }
  0xad   :  { %v110_v37 = vsel %vm109_vm3, %v101_v21, %v108_v34 }
  0xae   :  { %v113_v39 = vsel %vm111_vm5, %v112_v36, %v110_v37 }
  0xaf   :  { %v114_v40 = vsub.f32 %v100_v38, %v113_v39 }
  0xb1   :  { %v115_v41 = vadd.f32 5.0, %v114_v40 }
  0xb3   :  { %v116_v42 = vmax.f32 %v115_v41, 0.0 }
  0xb5   :  { %117 = vst.msk [vmem:[%s252_s3] sm:$0xff] %vm59_vm0, %v116_v42 }
  0xb6   :  { %122 = vsyncpa [#allocation5], 1 }
  0xb7   :  { %123 = vsyncpa [#allocation7], 1 }

</bundles_post_ra>
